<compile_context>
chip_gen: v7x
topology: tpu7x:2x2x1
jax: 0.10.0
libtpu: 0.0.40
codegen_flags: <defaults>
</compile_context>

<pallas_src>
import jax
import jax.numpy as jnp
from jax import lax
from jax.experimental import pallas as pl
from jax.experimental.pallas import tpu as pltpu

SELU_ALPHA = 1.6732632423543772
SELU_SCALE = 1.0507009873554805
_LANE = 128


def _selu_core(x):
    # SELU without the output scale (the scale is folded into downstream weights).
    return jnp.where(x > 0, x, SELU_ALPHA * (jnp.exp(x) - 1.0))


def _round_up(n, m):
    return ((n + m - 1) // m) * m


def _pick_tile(B, cap=4096, lane=_LANE):
    """Lane-dense batch tile; prefer >= 2 grid steps so both v7x TCs get work."""
    Bl = _round_up(B, lane)
    if Bl <= lane:
        return lane
    half = _round_up((Bl + 1) // 2, lane)
    return min(half, cap)


def energy_mlp_kernel(x_ref, w1_ref, b1_ref, w2_ref, b2_ref,
                      w3_ref, b3_ref, w4s_ref, out_ref):
    """One (tb, dim) batch tile. After layer 1 the batch lives on the lane axis."""
    # Layer 1: contract the feature axes of W1 (w, dim) and x (tb, dim) -> (w, tb).
    z = lax.dot_general(w1_ref[...], x_ref[...],
                        dimension_numbers=(((1,), (1,)), ((), ())),
                        preferred_element_type=jnp.float32)
    h = _selu_core(z + b1_ref[...])
    # Layers 2/3: plain NN matmuls, batch stays on lanes; SELU_SCALE is pre-folded
    # into w2/w3/w4s so only the unscaled SELU core runs here.
    h = _selu_core(jnp.dot(w2_ref[...], h, preferred_element_type=jnp.float32)
                   + b2_ref[...])
    h = _selu_core(jnp.dot(w3_ref[...], h, preferred_element_type=jnp.float32)
                   + b3_ref[...])
    # Folded layer-4 + sum(dim=-1): (1, w) @ (w, tb) -> lane-dense (1, tb) row.
    out_ref[...] = jnp.dot(w4s_ref[...], h, preferred_element_type=jnp.float32)


def energy_mlp(x, params, tile_cap=4096, compute_dtype=jnp.float32):
    """x: (B, dim) float32 -> (B,) float32, matching EnergyMLP.forward.

    params are torch-layout: Wi has shape (out_features, in_features), bi (out_features,).
    compute_dtype only affects the streamed x tile and W1 (weights/intermediates stay f32).
    """
    B, dim = x.shape
    w1, b1, w2, b2, w3, b3, w4, b4 = params
    w = w1.shape[0]

    # --- trace-time weight preprocessing (tiny arrays) ---------------------------
    # Fold the final Linear + sum over its outputs into a (1, w) vector, and fold
    # the SELU output scale of each preceding layer into the next layer's weights.
    w4s = jnp.sum(w4, axis=0, keepdims=True)                      # (1, w)
    b4_sum = jnp.sum(b4).astype(jnp.float32)                      # scalar, added on host
    w1c = w1.astype(compute_dtype)
    w2c = (SELU_SCALE * w2).astype(jnp.float32)
    w3c = (SELU_SCALE * w3).astype(jnp.float32)
    w4sc = (SELU_SCALE * w4s).astype(jnp.float32)
    b1c = b1.reshape(w, 1).astype(jnp.float32)
    b2c = b2.reshape(w, 1).astype(jnp.float32)
    b3c = b3.reshape(w, 1).astype(jnp.float32)

    # --- batch tiling -------------------------------------------------------------
    tb = _pick_tile(B, cap=int(tile_cap))
    B_pad = _round_up(B, tb)
    n_tiles = B_pad // tb

    x_pad = x if B_pad == B else jnp.pad(x, ((0, B_pad - B), (0, 0)))
    x_pad = x_pad.astype(compute_dtype)

    # --- cost / VMEM bookkeeping ---------------------------------------------------
    x_item = jnp.dtype(compute_dtype).itemsize
    flops = 2 * B_pad * (dim * w + w * w + w * w + w)
    transcendentals = 3 * B_pad * w
    resident_bytes = sum(int(a.size) * a.dtype.itemsize
                         for a in (w1c, b1c, w2c, b2c, w3c, b3c, w4sc))
    bytes_accessed = int(B_pad * dim * x_item + resident_bytes + B_pad * 4)

    # Rough VMEM budget: double-buffered x/out tiles + resident weights (x2) +
    # ~3 live (w, tb) f32 intermediates.  Only raise the limit if we'd exceed the
    # scoped default (matters on v7x's 64 MiB VMEM with big tiles / wide layers).
    vmem_need = (2 * tb * dim * x_item + 2 * tb * 4
                 + 2 * resident_bytes + 3 * w * tb * 4)
    cp_kwargs = dict(dimension_semantics=("parallel",))
    if vmem_need > 30 * 1024 * 1024:
        cp_kwargs["vmem_limit_bytes"] = int(min(2 * vmem_need, 60 * 1024 * 1024))

    const = lambda i: (0, 0)
    out = pl.pallas_call(
        energy_mlp_kernel,
        out_shape=jax.ShapeDtypeStruct((1, B_pad), jnp.float32),
        grid_spec=pltpu.PrefetchScalarGridSpec(
            num_scalar_prefetch=0,
            grid=(n_tiles,),
            in_specs=[
                pl.BlockSpec((tb, dim), lambda i: (i, 0)),   # streamed x tile
                pl.BlockSpec(w1c.shape, const),              # resident weights/biases
                pl.BlockSpec(b1c.shape, const),
                pl.BlockSpec(w2c.shape, const),
                pl.BlockSpec(b2c.shape, const),
                pl.BlockSpec(w3c.shape, const),
                pl.BlockSpec(b3c.shape, const),
                pl.BlockSpec(w4sc.shape, const),
            ],
            out_specs=pl.BlockSpec((1, tb), lambda i: (0, i)),
        ),
        compiler_params=pltpu.CompilerParams(**cp_kwargs),
        cost_estimate=pl.CostEstimate(flops=flops,
                                      transcendentals=transcendentals,
                                      bytes_accessed=bytes_accessed),
    )(x_pad, w1c, b1c, w2c, b2c, w3c, b3c, w4sc)
    return out[0, :B] + b4_sum


def init_params(key, dim, out_dim, w):
    """torch.nn.Linear default init: W ~ U(+-1/sqrt(fan_in)) with shape (out, in)."""
    dims = [(dim, w), (w, w), (w, w), (w, out_dim)]
    params = []
    for fan_in, fan_out in dims:
        key, kw, kb = jax.random.split(key, 3)
        bound = 1.0 / jnp.sqrt(float(fan_in))
        W = jax.random.uniform(kw, (fan_out, fan_in), jnp.float32, -bound, bound)
        b = jax.random.uniform(kb, (fan_out,), jnp.float32, -bound, bound)
        params += [W, b]
    return tuple(params)


def _selu_ref(x):
    return SELU_SCALE * jnp.where(x > 0, x, SELU_ALPHA * (jnp.exp(x) - 1.0))


def energy_mlp_ref(x, params):
    w1, b1, w2, b2, w3, b3, w4, b4 = params
    h = _selu_ref(x @ w1.T + b1)
    h = _selu_ref(h @ w2.T + b2)
    h = _selu_ref(h @ w3.T + b3)
    o = h @ w4.T + b4
    return jnp.sum(o, axis=-1)


if __name__ == "__main__":
    key = jax.random.PRNGKey(0)
    kx1, kx2, kp = jax.random.split(key, 3)

    dim, w = 16, 64                      # EnergyMLP(dim=16, w=64) -> out_dim=dim
    params = init_params(kp, dim, dim, w)

    # Small batch: single 128-lane tile with batch padding.
    x_small = jax.random.normal(kx1, (8, dim), dtype=jnp.float32)
    out_small = jax.block_until_ready(energy_mlp(x_small, params))
    ref_small = energy_mlp_ref(x_small, params)
    assert out_small.shape == (8,)
    assert jnp.allclose(out_small, ref_small, atol=1e-4, rtol=1e-4)

    # Multi-tile + batch-padding path (B=300 -> padded to 512, two grid steps).
    x_big = jax.random.normal(kx2, (300, dim), dtype=jnp.float32)
    out_big = jax.block_until_ready(energy_mlp(x_big, params))
    ref_big = energy_mlp_ref(x_big, params)
    assert out_big.shape == (300,)
    assert jnp.allclose(out_big, ref_big, atol=1e-4, rtol=1e-4)

    # Optional bf16 path (bf16 only on the streamed x tile + W1) -- looser tolerance.
    out_bf16 = jax.block_until_ready(
        energy_mlp(x_big, params, compute_dtype=jnp.bfloat16))
    assert out_bf16.shape == (300,)
    assert jnp.allclose(out_bf16, ref_big, atol=2e-1, rtol=5e-2)

    print("KERNEL_OK")
</pallas_src>

<mosaic_0001>
module attributes {stable_mosaic.version = 11 : i64} {
  func.func @energy_mlp_kernel(%arg0: i32, %arg1: memref<128x16xf32, #tpu.memory_space<vmem>>, %arg2: memref<64x16xf32, #tpu.memory_space<vmem>>, %arg3: memref<64x1xf32, #tpu.memory_space<vmem>>, %arg4: memref<64x64xf32, #tpu.memory_space<vmem>>, %arg5: memref<64x1xf32, #tpu.memory_space<vmem>>, %arg6: memref<64x64xf32, #tpu.memory_space<vmem>>, %arg7: memref<64x1xf32, #tpu.memory_space<vmem>>, %arg8: memref<1x64xf32, #tpu.memory_space<vmem>>, %arg9: memref<1x128xf32, #tpu.memory_space<vmem>>) attributes {dimension_semantics = [#tpu.dimension_semantics<parallel>], iteration_bounds = array<i64: 1>, scalar_prefetch = 0 : i64, scratch_operands = 0 : i64, tpu.core_type = #tpu.core_type<tc>, window_params = [{transform_indices = @transform_0, window_bounds = array<i64: 128, 16>}, {pipeline_mode = #tpu.pipeline_mode<synchronous>, transform_indices = @transform_1, window_bounds = array<i64: 64, 16>}, {pipeline_mode = #tpu.pipeline_mode<synchronous>, transform_indices = @transform_2, window_bounds = array<i64: 64, 1>}, {pipeline_mode = #tpu.pipeline_mode<synchronous>, transform_indices = @transform_3, window_bounds = array<i64: 64, 64>}, {pipeline_mode = #tpu.pipeline_mode<synchronous>, transform_indices = @transform_4, window_bounds = array<i64: 64, 1>}, {pipeline_mode = #tpu.pipeline_mode<synchronous>, transform_indices = @transform_5, window_bounds = array<i64: 64, 64>}, {pipeline_mode = #tpu.pipeline_mode<synchronous>, transform_indices = @transform_6, window_bounds = array<i64: 64, 1>}, {pipeline_mode = #tpu.pipeline_mode<synchronous>, transform_indices = @transform_7, window_bounds = array<i64: 1, 64>}, {transform_indices = @transform_8, window_bounds = array<i64: 1, 128>}]} {
    %c0 = arith.constant 0 : index
    %c0_0 = arith.constant 0 : index
    %0 = vector.load %arg2[%c0, %c0_0] : memref<64x16xf32, #tpu.memory_space<vmem>>, vector<64x16xf32>
    %c0_1 = arith.constant 0 : index
    %c0_2 = arith.constant 0 : index
    %1 = vector.load %arg1[%c0_1, %c0_2] : memref<128x16xf32, #tpu.memory_space<vmem>>, vector<128x16xf32>
    %cst = arith.constant dense<0.000000e+00> : vector<64x128xf32>
    %2 = tpu.matmul %0, %1, %cst {dimension_numbers = #tpu.dot_dimension_numbers<[1], [1], [0], [0], [0, 0, 1, 0], [], []>} : vector<64x16xf32>, vector<128x16xf32>, vector<64x128xf32> -> vector<64x128xf32>
    %c0_3 = arith.constant 0 : index
    %c0_4 = arith.constant 0 : index
    %3 = vector.load %arg3[%c0_3, %c0_4] : memref<64x1xf32, #tpu.memory_space<vmem>>, vector<64x1xf32>
    %4 = vector.broadcast %3 : vector<64x1xf32> to vector<64x128xf32>
    %5 = arith.addf %2, %4 : vector<64x128xf32>
    %cst_5 = arith.constant 0.000000e+00 : f32
    %6 = vector.broadcast %cst_5 : f32 to vector<64x128xf32>
    %7 = arith.cmpf ogt, %5, %6 : vector<64x128xf32>
    %8 = math.exp %5 : vector<64x128xf32>
    %cst_6 = arith.constant 1.000000e+00 : f32
    %9 = vector.broadcast %cst_6 : f32 to vector<64x128xf32>
    %10 = arith.subf %8, %9 : vector<64x128xf32>
    %cst_7 = arith.constant 1.67326319 : f32
    %11 = vector.broadcast %cst_7 : f32 to vector<64x128xf32>
    %12 = arith.mulf %11, %10 : vector<64x128xf32>
    %13 = arith.select %7, %5, %12 : vector<64x128xi1>, vector<64x128xf32>
    %c0_8 = arith.constant 0 : index
    %c0_9 = arith.constant 0 : index
    %14 = vector.load %arg4[%c0_8, %c0_9] : memref<64x64xf32, #tpu.memory_space<vmem>>, vector<64x64xf32>
    %cst_10 = arith.constant dense<0.000000e+00> : vector<64x128xf32>
    %15 = tpu.matmul %14, %13, %cst_10 {dimension_numbers = #tpu.dot_dimension_numbers<[1], [0], [0], [1], [0, 0, 1, 1], [], []>} : vector<64x64xf32>, vector<64x128xf32>, vector<64x128xf32> -> vector<64x128xf32>
    %c0_11 = arith.constant 0 : index
    %c0_12 = arith.constant 0 : index
    %16 = vector.load %arg5[%c0_11, %c0_12] : memref<64x1xf32, #tpu.memory_space<vmem>>, vector<64x1xf32>
    %17 = vector.broadcast %16 : vector<64x1xf32> to vector<64x128xf32>
    %18 = arith.addf %15, %17 : vector<64x128xf32>
    %cst_13 = arith.constant 0.000000e+00 : f32
    %19 = vector.broadcast %cst_13 : f32 to vector<64x128xf32>
    %20 = arith.cmpf ogt, %18, %19 : vector<64x128xf32>
    %21 = math.exp %18 : vector<64x128xf32>
    %cst_14 = arith.constant 1.000000e+00 : f32
    %22 = vector.broadcast %cst_14 : f32 to vector<64x128xf32>
    %23 = arith.subf %21, %22 : vector<64x128xf32>
    %cst_15 = arith.constant 1.67326319 : f32
    %24 = vector.broadcast %cst_15 : f32 to vector<64x128xf32>
    %25 = arith.mulf %24, %23 : vector<64x128xf32>
    %26 = arith.select %20, %18, %25 : vector<64x128xi1>, vector<64x128xf32>
    %c0_16 = arith.constant 0 : index
    %c0_17 = arith.constant 0 : index
    %27 = vector.load %arg6[%c0_16, %c0_17] : memref<64x64xf32, #tpu.memory_space<vmem>>, vector<64x64xf32>
    %cst_18 = arith.constant dense<0.000000e+00> : vector<64x128xf32>
    %28 = tpu.matmul %27, %26, %cst_18 {dimension_numbers = #tpu.dot_dimension_numbers<[1], [0], [0], [1], [0, 0, 1, 1], [], []>} : vector<64x64xf32>, vector<64x128xf32>, vector<64x128xf32> -> vector<64x128xf32>
    %c0_19 = arith.constant 0 : index
    %c0_20 = arith.constant 0 : index
    %29 = vector.load %arg7[%c0_19, %c0_20] : memref<64x1xf32, #tpu.memory_space<vmem>>, vector<64x1xf32>
    %30 = vector.broadcast %29 : vector<64x1xf32> to vector<64x128xf32>
    %31 = arith.addf %28, %30 : vector<64x128xf32>
    %cst_21 = arith.constant 0.000000e+00 : f32
    %32 = vector.broadcast %cst_21 : f32 to vector<64x128xf32>
    %33 = arith.cmpf ogt, %31, %32 : vector<64x128xf32>
    %34 = math.exp %31 : vector<64x128xf32>
    %cst_22 = arith.constant 1.000000e+00 : f32
    %35 = vector.broadcast %cst_22 : f32 to vector<64x128xf32>
    %36 = arith.subf %34, %35 : vector<64x128xf32>
    %cst_23 = arith.constant 1.67326319 : f32
    %37 = vector.broadcast %cst_23 : f32 to vector<64x128xf32>
    %38 = arith.mulf %37, %36 : vector<64x128xf32>
    %39 = arith.select %33, %31, %38 : vector<64x128xi1>, vector<64x128xf32>
    %c0_24 = arith.constant 0 : index
    %c0_25 = arith.constant 0 : index
    %40 = vector.load %arg8[%c0_24, %c0_25] : memref<1x64xf32, #tpu.memory_space<vmem>>, vector<1x64xf32>
    %cst_26 = arith.constant dense<0.000000e+00> : vector<1x128xf32>
    %41 = tpu.matmul %40, %39, %cst_26 {dimension_numbers = #tpu.dot_dimension_numbers<[1], [0], [0], [1], [0, 0, 1, 1], [], []>} : vector<1x64xf32>, vector<64x128xf32>, vector<1x128xf32> -> vector<1x128xf32>
    %c0_27 = arith.constant 0 : index
    %c0_28 = arith.constant 0 : index
    %42 = vector.load %arg9[%c0_27, %c0_28] : memref<1x128xf32, #tpu.memory_space<vmem>>, vector<1x128xf32>
    tpu.vector_store %arg9[%c0_27, %c0_28], %41 {strides = array<i32>} : memref<1x128xf32, #tpu.memory_space<vmem>>, vector<1x128xf32>,
    return
  }
  func.func @transform_0(%arg0: i32) -> (i32, i32) {
    %c0_i32 = arith.constant 0 : i32
    %c0_i32_0 = arith.constant 0 : i32
    return %arg0, %c0_i32 : i32, i32
  }
  func.func @transform_1(%arg0: i32) -> (i32, i32) {
    %c0_i32 = arith.constant 0 : i32
    %c0_i32_0 = arith.constant 0 : i32
    %c0_i32_1 = arith.constant 0 : i32
    return %c0_i32, %c0_i32_0 : i32, i32
  }
  func.func @transform_2(%arg0: i32) -> (i32, i32) {
    %c0_i32 = arith.constant 0 : i32
    %c0_i32_0 = arith.constant 0 : i32
    %c0_i32_1 = arith.constant 0 : i32
    return %c0_i32, %c0_i32_0 : i32, i32
  }
  func.func @transform_3(%arg0: i32) -> (i32, i32) {
    %c0_i32 = arith.constant 0 : i32
    %c0_i32_0 = arith.constant 0 : i32
    %c0_i32_1 = arith.constant 0 : i32
    return %c0_i32, %c0_i32_0 : i32, i32
  }
  func.func @transform_4(%arg0: i32) -> (i32, i32) {
    %c0_i32 = arith.constant 0 : i32
    %c0_i32_0 = arith.constant 0 : i32
    %c0_i32_1 = arith.constant 0 : i32
    return %c0_i32, %c0_i32_0 : i32, i32
  }
  func.func @transform_5(%arg0: i32) -> (i32, i32) {
    %c0_i32 = arith.constant 0 : i32
    %c0_i32_0 = arith.constant 0 : i32
    %c0_i32_1 = arith.constant 0 : i32
    return %c0_i32, %c0_i32_0 : i32, i32
  }
  func.func @transform_6(%arg0: i32) -> (i32, i32) {
    %c0_i32 = arith.constant 0 : i32
    %c0_i32_0 = arith.constant 0 : i32
    %c0_i32_1 = arith.constant 0 : i32
    return %c0_i32, %c0_i32_0 : i32, i32
  }
  func.func @transform_7(%arg0: i32) -> (i32, i32) {
    %c0_i32 = arith.constant 0 : i32
    %c0_i32_0 = arith.constant 0 : i32
    %c0_i32_1 = arith.constant 0 : i32
    return %c0_i32, %c0_i32_0 : i32, i32
  }
  func.func @transform_8(%arg0: i32) -> (i32, i32) {
    %c0_i32 = arith.constant 0 : i32
    %c0_i32_0 = arith.constant 0 : i32
    return %c0_i32, %arg0 : i32, i32
  }
}

</mosaic_0001>

<bundles_post_ra>
// kernel: tpu_custom_call.1
= control target key start
LH: loop header
LB: loop body
LE: loop exit
PB: predicated region body
PF: predicated region fallthrough
CT: control target
= control target key end

     0   :  { %vm102_vm0 = vcmask 130048   ;;  %v1304_v6 = vmov 0   ;;  %s1628_s0 = inlined_call_operand.vmem [shape: f32[128,16], index: 0, kind: input, shape index: {}]   ;;  %s1629_s1 = inlined_call_operand.vmem [shape: f32[64,16], index: 1, kind: input, shape index: {}]   ;;  %s1630_s2 = inlined_call_operand.vmem [shape: f32[64,1], index: 2, kind: input, shape index: {}]   ;;  %s1631_s3 = inlined_call_operand.vmem [shape: f32[64,64], index: 3, kind: input, shape index: {}]   ;;  %s1632_s4 = inlined_call_operand.vmem [shape: f32[64,1], index: 4, kind: input, shape index: {}]   ;;  %s1633_s5 = inlined_call_operand.vmem [shape: f32[64,64], index: 5, kind: input, shape index: {}]   ;;  %s1634_s6 = inlined_call_operand.vmem [shape: f32[64,1], index: 6, kind: input, shape index: {}]   ;;  %s1635_s7 = inlined_call_operand.vmem [shape: f32[1,64], index: 7, kind: input, shape index: {}]   ;;  %s1636_s8 = inlined_call_operand.hbm [shape: f32[1,128], index: 8, kind: output, shape index: {}]  }
   0x1   :  { %v38_v0 = vld [vmem:[%s1628_s0] sm:$0xff]  ;;  %v39_v1 = vld [vmem:[%s1628_s0 + $0x8] sm:$0xff]  ;;  %v40_v2 = vld [vmem:[%s1628_s0 + $0x10] sm:$0xff]  ;;  %1230 = vset.pattern.permute.xlu0 %v1304_v6  ;;  %1231 = vset.pattern.permute.xlu1 %v1304_v6 }
   0x2   :  { %v1133_v3 = vpack.c.bf16 %v39_v1, %v38_v0  ;;  %vm1365_vm1 = vmpackc.low %vm102_vm0, %vm102_vm0  ;;  %v41_v5 = vld [vmem:[%s1628_s0 + $0x18] sm:$0xff]  ;;  %v30_v8 = vld [vmem:[%s1629_s1] sm:$0xff] }
   0x3   :  { %v1139_v7 = vpack.c.bf16 %v41_v5, %v40_v2  ;;  %v42_v9 = vld [vmem:[%s1628_s0 + $0x20] sm:$0xff]  ;;  %v43_v10 = vld [vmem:[%s1628_s0 + $0x28] sm:$0xff]  ;;  %1046 = vmatprep.mubr.msk.f32.mxu0 %vm102_vm0, %v30_v8  ;;  %v56_v12 = vld [vmem:[%s1630_s2 + $0x10] sm:$0xff] }
   0x4   :  { %1135 = vmatprep.subr.msk.bf16.mxu0 %vm1365_vm1, %v1133_v3  ;;  %v54_v11 = vld [vmem:[%s1630_s2] sm:$0xff]  ;;  %v1145_v13 = vpack.c.bf16 %v43_v10, %v42_v9  ;;  %74 = vperm.xlu1 %1231, %v56_v12   ;;  %v55_v14 = vld [vmem:[%s1630_s2 + $0x8] sm:$0xff]  ;;  %v57_v15 = vld [vmem:[%s1630_s2 + $0x18] sm:$0xff] }
   0x5   :  { %1138 = vmatpush3.bf16.xpose.msk.msra.mxu0 %vm1365_vm1, %v1133_v3  ;;  %64 = vperm.xlu0 %1230, %v54_v11   ;;  %v44_v16 = vld [vmem:[%s1628_s0 + $0x30] sm:$0xff]  ;;  %v45_v17 = vld [vmem:[%s1628_s0 + $0x38] sm:$0xff]  ;;  %v58_v18 = vld [vmem:[%s1630_s2 + $0x20] sm:$0xff] }
   0x6   :  { %1141 = vmatprep.subr.msk.bf16.mxu0 %vm1365_vm1, %v1139_v7  ;;  %v59_v19 = vld [vmem:[%s1630_s2 + $0x28] sm:$0xff] }
   0x8   :  { %79 = vperm.xlu1 %1231, %v57_v15  }
   0x9   :  { %69 = vperm.xlu0 %1230, %v55_v14  }
   0xd   :  { %1144 = vmatpush3.bf16.xpose.msk.msra.mxu0 %vm1365_vm1, %v1139_v7 }
   0xe   :  { %1147 = vmatprep.subr.msk.bf16.mxu0 %vm1365_vm1, %v1145_v13 }
   0xf   :  { %13 = vsyncpa [#allocation3], 0  ;;  %v1151_v20 = vpack.c.bf16 %v45_v17, %v44_v16  ;;  %84 = vperm.xlu0 %1230, %v58_v18   ;;  %89 = vperm.xlu1 %1231, %v59_v19   ;;  %v60_v21 = vld [vmem:[%s1630_s2 + $0x30] sm:$0xff]  ;;  %v61_v22 = vld [vmem:[%s1630_s2 + $0x38] sm:$0xff]  ;;  %vm384_vm2 = vcmask 523264   ;;  %s1308_s10 = smov [#allocation2]  }
  0x10   :  { %v46_v23 = vld [vmem:[%s1628_s0 + $0x40] sm:$0xff]  ;;  %v47_v24 = vld [vmem:[%s1628_s0 + $0x48] sm:$0xff]  ;;  %v338_v28 = vld [vmem:[%s1632_s4 + $0x10] sm:$0xff]  ;;  %s876_s11 = sshll.u32 %s1308_s10, 4  ;;  %s877_s11 = int_to_ptr.vmem [resolvable:$true] %s876_s11 }
  0x11   :  { %v336_v25 = vld [vmem:[%s1632_s4] sm:$0xff]  ;;  %v337_v26 = vld [vmem:[%s1632_s4 + $0x8] sm:$0xff]  ;;  %v1157_v27 = vpack.c.bf16 %v47_v24, %v46_v23  ;;  %v339_v29 = vld [vmem:[%s1632_s4 + $0x18] sm:$0xff]  ;;  %s1280_s12 = scalar_lea.vmem %s877_s11, 16  ;;  %s1284_s13 = scalar_lea.vmem %s877_s11, 32 }
  0x12   :  { %v48_v30 = vld [vmem:[%s1628_s0 + $0x50] sm:$0xff]  ;;  %v49_v31 = vld [vmem:[%s1628_s0 + $0x58] sm:$0xff]  ;;  %v340_v32 = vld [vmem:[%s1632_s4 + $0x20] sm:$0xff]  ;;  %p1281_p0 = scmp.ne.s32.totalorder %s877_s11, %s1280_s12  ;;  %p1285_p1 = scmp.lt.s32.totalorder %s877_s11, %s877_s11 }
  0x13   :  { %94 = vperm.xlu0 %1230, %v60_v21   ;;  %99 = vperm.xlu1 %1231, %v61_v22   ;;  %v341_v33 = vld [vmem:[%s1632_s4 + $0x28] sm:$0xff]  ;;  %v1163_v34 = vpack.c.bf16 %v49_v31, %v48_v30  ;;  %v342_v35 = vld [vmem:[%s1632_s4 + $0x30] sm:$0xff]  ;;  %v343_v36 = vld [vmem:[%s1632_s4 + $0x38] sm:$0xff]  ;;  %p1286_p2 = scmp.lt.s32.totalorder %s1284_s13, %s1280_s12 }
  0x14   :  { %v50_v37 = vld [vmem:[%s1628_s0 + $0x60] sm:$0xff]  ;;  %v51_v38 = vld [vmem:[%s1628_s0 + $0x68] sm:$0xff]  ;;  %v572_v42 = vld [vmem:[%s1634_s6 + $0x10] sm:$0xff] }
  0x15   :  { %1150 = vmatpush3.bf16.xpose.msk.msra.mxu0 %vm1365_vm1, %v1145_v13  ;;  %v570_v39 = vld [vmem:[%s1634_s6] sm:$0xff]  ;;  %v571_v40 = vld [vmem:[%s1634_s6 + $0x8] sm:$0xff]  ;;  %v1169_v41 = vpack.c.bf16 %v51_v38, %v50_v37  ;;  %v573_v43 = vld [vmem:[%s1634_s6 + $0x18] sm:$0xff]  ;;  %p1287_p3 = por %p1286_p2, %p1285_p1 }
  0x16   :  { %1153 = vmatprep.subr.msk.bf16.mxu0 %vm1365_vm1, %v1151_v20  ;;  %v52_v44 = vld [vmem:[%s1628_s0 + $0x70] sm:$0xff]  ;;  %v53_v45 = vld [vmem:[%s1628_s0 + $0x78] sm:$0xff]  ;;  %v574_v46 = vld [vmem:[%s1634_s6 + $0x20] sm:$0xff] }
  0x17   :  { %346 = vperm.xlu0 %1230, %v336_v25   ;;  %351 = vperm.xlu1 %1231, %v337_v26   ;;  %v575_v47 = vld [vmem:[%s1634_s6 + $0x28] sm:$0xff]  ;;  %v1175_v48 = vpack.c.bf16 %v53_v45, %v52_v44  ;;  %v576_v49 = vld [vmem:[%s1634_s6 + $0x30] sm:$0xff]  ;;  %v577_v50 = vld [vmem:[%s1634_s6 + $0x38] sm:$0xff]  ;;  %p1288_p4 = pnand %p1287_p3, %p1281_p0 }
  0x18   :  { %v31_v51 = vld [vmem:[%s1629_s1 + $0x8] sm:$0xff]  ;;  %v32_v52 = vld [vmem:[%s1629_s1 + $0x10] sm:$0xff]  ;;  %v33_v53 = vld [vmem:[%s1629_s1 + $0x18] sm:$0xff] }
  0x19   :  { %v34_v54 = vld [vmem:[%s1629_s1 + $0x20] sm:$0xff]  ;;  %v35_v55 = vld [vmem:[%s1629_s1 + $0x28] sm:$0xff]  ;;  %v36_v56 = vld [vmem:[%s1629_s1 + $0x30] sm:$0xff] }
  0x1a   :  { %v37_v57 = vld [vmem:[%s1629_s1 + $0x38] sm:$0xff]  ;;  %v328_v58 = vld [vmem:[%s1631_s3] sm:$0xff] }
  0x1b   :  { %356 = vperm.xlu0 %1230, %v338_v28   ;;  %361 = vperm.xlu1 %1231, %v339_v29  }
  0x1c   :  { %1074 = vmatprep.mubr.msk.f32.mxu1 %vm384_vm2, %v328_v58 }
  0x1d   :  { %1156 = vmatpush3.bf16.xpose.msk.msra.mxu0 %vm1365_vm1, %v1151_v20 }
  0x1e   :  { %1159 = vmatprep.subr.msk.bf16.mxu0 %vm1365_vm1, %v1157_v27 }
  0x1f   :  { %366 = vperm.xlu0 %1230, %v340_v32   ;;  %371 = vperm.xlu1 %1231, %v341_v33  }
  0x23   :  { %376 = vperm.xlu0 %1230, %v342_v35   ;;  %381 = vperm.xlu1 %1231, %v343_v36  }
  0x25   :  { %1162 = vmatpush3.bf16.xpose.msk.msra.mxu0 %vm1365_vm1, %v1157_v27 }
  0x26   :  { %1165 = vmatprep.subr.msk.bf16.mxu0 %vm1365_vm1, %v1163_v34 }
  0x27   :  { %580 = vperm.xlu0 %1230, %v570_v39   ;;  %585 = vperm.xlu1 %1231, %v571_v40  }
  0x2b   :  { %590 = vperm.xlu0 %1230, %v572_v42   ;;  %595 = vperm.xlu1 %1231, %v573_v43  }
  0x2d   :  { %1168 = vmatpush3.bf16.xpose.msk.msra.mxu0 %vm1365_vm1, %v1163_v34 }
  0x2e   :  { %1171 = vmatprep.subr.msk.bf16.mxu0 %vm1365_vm1, %v1169_v41 }
  0x2f   :  { %600 = vperm.xlu0 %1230, %v574_v46   ;;  %605 = vperm.xlu1 %1231, %v575_v47  }
  0x33   :  { %610 = vperm.xlu0 %1230, %v576_v49   ;;  %615 = vperm.xlu1 %1231, %v577_v50  }
  0x35   :  { %1174 = vmatpush3.bf16.xpose.msk.msra.mxu0 %vm1365_vm1, %v1169_v41 }
  0x36   :  { %1177 = vmatprep.subr.msk.bf16.mxu0 %vm1365_vm1, %v1175_v48 }
  0x3d   :  { %1180 = vmatpush3.bf16.xpose.msk.msra.mxu0 %vm1365_vm1, %v1175_v48 }
  0x44   :  { %1047 = vmatmul.mubr.msk.f32.vlgmr.msra.gmra.mrb[0].mxu0 %vm102_vm0, %v31_v51 }
  0x45   :  { %1049 = vmatprep.mubr.msk.f32.mxu0 %vm102_vm0, %v32_v52 }
  0x48   :  { %1050 = vmatmul.mubr.msk.f32.gmra.mrb[2].mxu0 %vm102_vm0, %v33_v53 }
  0x49   :  { %1052 = vmatprep.mubr.msk.f32.mxu0 %vm102_vm0, %v34_v54 }
  0x4c   :  { %1053 = vmatmul.mubr.msk.f32.gmra.mrb[4].mxu0 %vm102_vm0, %v35_v55 }
  0x4d   :  { %1055 = vmatprep.mubr.msk.f32.mxu0 %vm102_vm0, %v36_v56 }
  0x50   :  { %1056 = vmatmul.mubr.msk.f32.gmra.mrb[6].mxu0 %vm102_vm0, %v37_v57 }
  0x83   :  { %v75_v60 = vpop.permute.xlu1 %74 }
  0x84   :  { %v65_v59 = vpop.permute.xlu0 %64 }
  0x87   :  { %v80_v62 = vpop.permute.xlu1 %79 }
  0x88   :  { %v70_v61 = vpop.permute.xlu0 %69 }
  0x8e   :  { %v90_v8 = vpop.permute.xlu1 %89  ;;  %v85_v10 = vpop.permute.xlu0 %84 }
  0x92   :  { %v100_v18 = vpop.permute.xlu1 %99  ;;  %v95_v21 = vpop.permute.xlu0 %94 }
 0x117   :  { %v1048_v63 = vpop.f32.mrb[0].mxu0 }
 0x118   :  { %v247_v0 = vadd.f32 %v1048_v63, %v70_v61  ;;  %v241_v1 = vpop.f32.mrb[1].mxu0  ;;  %v329_v63 = vld [vmem:[%s1631_s3 + $0x8] sm:$0xff] }
 0x119   :  { %v242_v2 = vadd.f32 %v241_v1, %v65_v59  ;;  %v331_v1 = vld [vmem:[%s1631_s3 + $0x18] sm:$0xff] }
 0x11a   :  { %v290_v3 = vmul.f32 1.442695, %v247_v0  ;;  %vm281_vm3 = vcmp.gt.f32.partialorder %v247_v0, 0.0 }
 0x11b   :  { %v288_v4 = vmul.f32 1.442695, %v242_v2  ;;  %v1051_v5 = vpop.f32.mrb[2].mxu0  ;;  %vm280_vm4 = vcmp.gt.f32.partialorder %v242_v2, 0.0 }
 0x11c   :  { %1232 = vpow2.f32 %v290_v3  ;;  %v257_v6 = vadd.f32 %v1051_v5, %v80_v62  ;;  %v251_v7 = vpop.f32.mrb[3].mxu0  ;;  %v333_v3 = vld [vmem:[%s1631_s3 + $0x28] sm:$0xff]  ;;  %v335_v5 = vld [vmem:[%s1631_s3 + $0x38] sm:$0xff] }
 0x11d   :  { %1234 = vpow2.f32 %v288_v4  ;;  %v252_v9 = vadd.f32 %v251_v7, %v75_v60  ;;  %v334_v4 = vld [vmem:[%s1631_s3 + $0x30] sm:$0xff]  ;;  %v352_v7 = vpop.permute.xlu1 %351 }
 0x11e   :  { %v294_v11 = vmul.f32 1.442695, %v257_v6  ;;  %vm283_vm5 = vcmp.gt.f32.partialorder %v257_v6, 0.0 }
 0x11f   :  { %v292_v12 = vmul.f32 1.442695, %v252_v9  ;;  %v1054_v13 = vpop.f32.mrb[4].mxu0  ;;  %vm282_vm6 = vcmp.gt.f32.partialorder %v252_v9, 0.0 }
 0x120   :  { %1236 = vpow2.f32 %v294_v11  ;;  %v267_v14 = vadd.f32 %v1054_v13, %v90_v8  ;;  %v261_v15 = vpop.f32.mrb[5].mxu0  ;;  %v347_v8 = vpop.permute.xlu0 %346 }
 0x121   :  { %1238 = vpow2.f32 %v292_v12  ;;  %v262_v16 = vadd.f32 %v261_v15, %v85_v10 }
 0x122   :  { %v298_v17 = vmul.f32 1.442695, %v267_v14  ;;  %vm285_vm7 = vcmp.gt.f32.partialorder %v267_v14, 0.0 }
 0x123   :  { %v296_v19 = vmul.f32 1.442695, %v262_v16  ;;  %v1057_v20 = vpop.f32.mrb[6].mxu0  ;;  %vm284_vm8 = vcmp.gt.f32.partialorder %v262_v16, 0.0 }
 0x124   :  { %1240 = vpow2.f32 %v298_v17  ;;  %v277_v22 = vadd.f32 %v1057_v20, %v100_v18  ;;  %v271_v23 = vpop.f32.mrb[7].mxu0  ;;  %v357_v11 = vpop.permute.xlu0 %356 }
 0x125   :  { %1242 = vpow2.f32 %v296_v19  ;;  %v272_v24 = vadd.f32 %v271_v23, %v95_v21 }
 0x126   :  { %v1233_v25 = vpop.eup %1232  ;;  %v302_v26 = vmul.f32 1.442695, %v277_v22  ;;  %vm287_vm9 = vcmp.gt.f32.partialorder %v277_v22, 0.0 }
 0x127   :  { %v1235_v27 = vpop.eup %1234  ;;  %v300_v28 = vmul.f32 1.442695, %v272_v24  ;;  %v909_v29 = vadd.f32 -1.0, %v1233_v25  ;;  %vm286_vm10 = vcmp.gt.f32.partialorder %v272_v24, 0.0 }
 0x128   :  { %1244 = vpow2.f32 %v302_v26  ;;  %v908_v30 = vadd.f32 -1.0, %v1235_v27 }
 0x129   :  { %1246 = vpow2.f32 %v300_v28  ;;  %v313_v31 = vmul.f32 1.6732632, %v909_v29 }
 0x12a   :  { %v1237_v32 = vpop.eup %1236  ;;  %v312_v33 = vmul.f32 1.6732632, %v908_v30 }
 0x12b   :  { %v1239_v34 = vpop.eup %1238  ;;  %v911_v35 = vadd.f32 -1.0, %v1237_v32  ;;  %v321_v36 = vsel %vm281_vm3, %v247_v0, %v313_v31  ;;  %v330_v0 = vld [vmem:[%s1631_s3 + $0x10] sm:$0xff] }
 0x12c   :  { %v910_v37 = vadd.f32 -1.0, %v1239_v34  ;;  %v320_v38 = vsel %vm280_vm4, %v242_v2, %v312_v33  ;;  %v332_v2 = vld [vmem:[%s1631_s3 + $0x20] sm:$0xff]  ;;  %vm1306_vm4 = vmmov 0  }
 0x12d   :  { %v315_v39 = vmul.f32 1.6732632, %v911_v35  ;;  %v1181_v40 = vpack.c.bf16 %v321_v36, %v320_v38 }
 0x12e   :  { %v1241_v41 = vpop.eup %1240  ;;  %v314_v42 = vmul.f32 1.6732632, %v910_v37 }
 0x12f   :  { %v1243_v43 = vpop.eup %1242  ;;  %v913_v44 = vadd.f32 -1.0, %v1241_v41  ;;  %1182 = vmatprep.subr.bf16.mxu1 %v1181_v40  ;;  %v323_v45 = vsel %vm283_vm5, %v257_v6, %v315_v39  ;;  %v562_v6 = vld [vmem:[%s1633_s5] sm:$0xff] }
 0x130   :  { %v912_v46 = vadd.f32 -1.0, %v1243_v43  ;;  %1184 = vmatpush3.bf16.msra.mxu1 %v1181_v40  ;;  %v322_v47 = vsel %vm282_vm6, %v252_v9, %v314_v42  ;;  %v362_v9 = vpop.permute.xlu1 %361 }
 0x131   :  { %v317_v48 = vmul.f32 1.6732632, %v913_v44  ;;  %v1185_v49 = vpack.c.bf16 %v323_v45, %v322_v47 }
 0x132   :  { %v1245_v50 = vpop.eup %1244  ;;  %v316_v51 = vmul.f32 1.6732632, %v912_v46 }
 0x133   :  { %v1247_v52 = vpop.eup %1246  ;;  %v915_v53 = vadd.f32 -1.0, %v1245_v50  ;;  %1186 = vmatprep.subr.bf16.mxu1 %v1185_v49  ;;  %v325_v54 = vsel %vm285_vm7, %v267_v14, %v317_v48 }
 0x134   :  { %v914_v55 = vadd.f32 -1.0, %v1247_v52  ;;  %1188 = vmatpush3.bf16.msra.mxu1 %v1185_v49  ;;  %v324_v56 = vsel %vm284_vm8, %v262_v16, %v316_v51  ;;  %v372_v20 = vpop.permute.xlu1 %371 }
 0x135   :  { %v319_v57 = vmul.f32 1.6732632, %v915_v53  ;;  %v1189_v58 = vpack.c.bf16 %v325_v54, %v324_v56 }
 0x136   :  { %v318_v59 = vmul.f32 1.6732632, %v914_v55 }
 0x137   :  { %1190 = vmatprep.subr.bf16.mxu1 %v1189_v58  ;;  %v327_v60 = vsel %vm287_vm9, %v277_v22, %v319_v57  ;;  %v367_v22 = vpop.permute.xlu0 %366 }
 0x138   :  { %1192 = vmatpush3.bf16.msra.mxu1 %v1189_v58  ;;  %v326_v61 = vsel %vm286_vm10, %v272_v24, %v318_v59  ;;  %v382_v30 = vpop.permute.xlu1 %381 }
 0x139   :  { %v1193_v62 = vpack.c.bf16 %v327_v60, %v326_v61 }
 0x13b   :  { %1194 = vmatprep.subr.bf16.mxu1 %v1193_v62  ;;  %v377_v33 = vpop.permute.xlu0 %376 }
 0x13c   :  { %1196 = vmatpush3.bf16.msra.mxu1 %v1193_v62 }
 0x13f   :  { %1075 = vmatmul.mubr.msk.f32.vlgmr.msra.gmra.mrb[0].mxu1 %vm384_vm2, %v329_v63 }
 0x140   :  { %1077 = vmatprep.mubr.msk.f32.mxu1 %vm384_vm2, %v330_v0 }
 0x143   :  { %1078 = vmatmul.mubr.msk.f32.gmra.mrb[2].mxu1 %vm384_vm2, %v331_v1 }
 0x144   :  { %1080 = vmatprep.mubr.msk.f32.mxu1 %vm384_vm2, %v332_v2 }
 0x147   :  { %1081 = vmatmul.mubr.msk.f32.gmra.mrb[4].mxu1 %vm384_vm2, %v333_v3 }
 0x148   :  { %1083 = vmatprep.mubr.msk.f32.mxu1 %vm384_vm2, %v334_v4 }
 0x14b   :  { %1084 = vmatmul.mubr.msk.f32.gmra.mrb[6].mxu1 %vm384_vm2, %v335_v5 }
 0x14c   :  { %1102 = vmatprep.mubr.msk.f32.mxu1 %vm384_vm2, %v562_v6 }
 0x212   :  { %v1076_v10 = vpop.f32.mrb[0].mxu1 }
 0x213   :  { %v481_v12 = vadd.f32 %v1076_v10, %v352_v7  ;;  %v475_v13 = vpop.f32.mrb[1].mxu1 }
 0x214   :  { %v476_v14 = vadd.f32 %v475_v13, %v347_v8  ;;  %v565_v13 = vld [vmem:[%s1633_s5 + $0x18] sm:$0xff] }
 0x215   :  { %v524_v15 = vmul.f32 1.442695, %v481_v12  ;;  %vm515_vm11 = vcmp.gt.f32.partialorder %v481_v12, 0.0 }
 0x216   :  { %v522_v16 = vmul.f32 1.442695, %v476_v14  ;;  %v1079_v17 = vpop.f32.mrb[2].mxu1  ;;  %vm514_vm12 = vcmp.gt.f32.partialorder %v476_v14, 0.0 }
 0x217   :  { %1248 = vpow2.f32 %v524_v15  ;;  %v491_v18 = vadd.f32 %v1079_v17, %v362_v9  ;;  %v485_v19 = vpop.f32.mrb[3].mxu1  ;;  %v567_v15 = vld [vmem:[%s1633_s5 + $0x28] sm:$0xff]  ;;  %v569_v17 = vld [vmem:[%s1633_s5 + $0x38] sm:$0xff] }
 0x218   :  { %1250 = vpow2.f32 %v522_v16  ;;  %v486_v21 = vadd.f32 %v485_v19, %v357_v11  ;;  %v563_v11 = vld [vmem:[%s1633_s5 + $0x8] sm:$0xff]  ;;  %v568_v16 = vld [vmem:[%s1633_s5 + $0x30] sm:$0xff]  ;;  %v1307_v19 = vmov 0.0  }
 0x219   :  { %v528_v23 = vmul.f32 1.442695, %v491_v18  ;;  %vm517_vm13 = vcmp.gt.f32.partialorder %v491_v18, 0.0 }
 0x21a   :  { %v526_v24 = vmul.f32 1.442695, %v486_v21  ;;  %v1082_v25 = vpop.f32.mrb[4].mxu1  ;;  %vm516_vm14 = vcmp.gt.f32.partialorder %v486_v21, 0.0 }
 0x21b   :  { %1252 = vpow2.f32 %v528_v23  ;;  %v501_v26 = vadd.f32 %v1082_v25, %v372_v20  ;;  %v495_v27 = vpop.f32.mrb[5].mxu1  ;;  %v586_v20 = vpop.permute.xlu1 %585 }
 0x21c   :  { %1254 = vpow2.f32 %v526_v24  ;;  %v496_v28 = vadd.f32 %v495_v27, %v367_v22 }
 0x21d   :  { %v532_v29 = vmul.f32 1.442695, %v501_v26  ;;  %vm519_vm15 = vcmp.gt.f32.partialorder %v501_v26, 0.0 }
 0x21e   :  { %v530_v31 = vmul.f32 1.442695, %v496_v28  ;;  %v1085_v32 = vpop.f32.mrb[6].mxu1  ;;  %vm518_vm0 = vcmp.gt.f32.partialorder %v496_v28, 0.0 }
 0x21f   :  { %1256 = vpow2.f32 %v532_v29  ;;  %v511_v34 = vadd.f32 %v1085_v32, %v382_v30  ;;  %v505_v35 = vpop.f32.mrb[7].mxu1  ;;  %v596_v22 = vpop.permute.xlu1 %595 }
 0x220   :  { %1258 = vpow2.f32 %v530_v31  ;;  %v506_v36 = vadd.f32 %v505_v35, %v377_v33 }
 0x221   :  { %v1249_v37 = vpop.eup %1248  ;;  %v536_v38 = vmul.f32 1.442695, %v511_v34  ;;  %vm521_vm1 = vcmp.gt.f32.partialorder %v511_v34, 0.0 }
 0x222   :  { %v1251_v39 = vpop.eup %1250  ;;  %v925_v40 = vadd.f32 -1.0, %v1249_v37  ;;  %v534_v41 = vmul.f32 1.442695, %v506_v36  ;;  %vm520_vm3 = vcmp.gt.f32.partialorder %v506_v36, 0.0 }
 0x223   :  { %v924_v42 = vadd.f32 -1.0, %v1251_v39  ;;  %1260 = vpow2.f32 %v536_v38  ;;  %v606_v33 = vpop.permute.xlu1 %605 }
 0x224   :  { %v547_v43 = vmul.f32 1.6732632, %v925_v40  ;;  %1262 = vpow2.f32 %v534_v41 }
 0x225   :  { %v1253_v44 = vpop.eup %1252  ;;  %v546_v45 = vmul.f32 1.6732632, %v924_v42 }
 0x226   :  { %v1255_v46 = vpop.eup %1254  ;;  %v927_v47 = vadd.f32 -1.0, %v1253_v44  ;;  %v555_v48 = vsel %vm515_vm11, %v481_v12, %v547_v43  ;;  %v564_v12 = vld [vmem:[%s1633_s5 + $0x10] sm:$0xff] }
 0x227   :  { %v926_v49 = vadd.f32 -1.0, %v1255_v46  ;;  %v554_v50 = vsel %vm514_vm12, %v476_v14, %v546_v45  ;;  %v566_v14 = vld [vmem:[%s1633_s5 + $0x20] sm:$0xff]  ;;  %v616_v43 = vpop.permute.xlu1 %615 }
 0x228   :  { %v549_v51 = vmul.f32 1.6732632, %v927_v47  ;;  %v1197_v52 = vpack.c.bf16 %v555_v48, %v554_v50 }
 0x229   :  { %v1257_v53 = vpop.eup %1256  ;;  %v548_v54 = vmul.f32 1.6732632, %v926_v49 }
 0x22a   :  { %v1259_v55 = vpop.eup %1258  ;;  %v929_v56 = vadd.f32 -1.0, %v1257_v53  ;;  %1198 = vmatprep.subr.bf16.mxu1 %v1197_v52  ;;  %v557_v57 = vsel %vm517_vm13, %v491_v18, %v549_v51  ;;  %v1305_v18 = vmov 0.0|0.0  }
 0x22b   :  { %v928_v58 = vadd.f32 -1.0, %v1259_v55  ;;  %1200 = vmatpush3.bf16.msra.mxu1 %v1197_v52  ;;  %v556_v59 = vsel %vm516_vm14, %v486_v21, %v548_v54  ;;  %v581_v21 = vpop.permute.xlu0 %580 }
 0x22c   :  { %v551_v60 = vmul.f32 1.6732632, %v929_v56  ;;  %v1201_v61 = vpack.c.bf16 %v557_v57, %v556_v59 }
 0x22d   :  { %v1261_v62 = vpop.eup %1260  ;;  %v550_v63 = vmul.f32 1.6732632, %v928_v58 }
 0x22e   :  { %v1263_v0 = vpop.eup %1262  ;;  %v931_v1 = vadd.f32 -1.0, %v1261_v62  ;;  %1202 = vmatprep.subr.bf16.mxu1 %v1201_v61  ;;  %v559_v2 = vsel %vm519_vm15, %v501_v26, %v551_v60 }
 0x22f   :  { %v930_v3 = vadd.f32 -1.0, %v1263_v0  ;;  %1204 = vmatpush3.bf16.msra.mxu1 %v1201_v61  ;;  %v558_v4 = vsel %vm518_vm0, %v496_v28, %v550_v63  ;;  %v591_v24 = vpop.permute.xlu0 %590 }
 0x230   :  { %v553_v5 = vmul.f32 1.6732632, %v931_v1  ;;  %v1205_v6 = vpack.c.bf16 %v559_v2, %v558_v4 }
 0x231   :  { %v552_v7 = vmul.f32 1.6732632, %v930_v3 }
 0x232   :  { %1206 = vmatprep.subr.bf16.mxu1 %v1205_v6  ;;  %v561_v8 = vsel %vm521_vm1, %v511_v34, %v553_v5 }
 0x233   :  { %1208 = vmatpush3.bf16.msra.mxu1 %v1205_v6  ;;  %v560_v9 = vsel %vm520_vm3, %v506_v36, %v552_v7  ;;  %v601_v35 = vpop.permute.xlu0 %600 }
 0x234   :  { %v1209_v10 = vpack.c.bf16 %v561_v8, %v560_v9 }
 0x236   :  { %1210 = vmatprep.subr.bf16.mxu1 %v1209_v10 }
 0x237   :  { %1212 = vmatpush3.bf16.msra.mxu1 %v1209_v10  ;;  %v611_v46 = vpop.permute.xlu0 %610 }
 0x238   :  { %1213 = vmatprep.subr.bf16.mxu1 %v1305_v18 }
 0x23a   :  { %1103 = vmatmul.mubr.msk.f32.vlgmr.msra.gmra.mrb[8].mxu1 %vm384_vm2, %v563_v11 }
 0x23b   :  { %1105 = vmatprep.mubr.msk.f32.mxu1 %vm384_vm2, %v564_v12 }
 0x23e   :  { %1106 = vmatmul.mubr.msk.f32.gmra.mrb[10].mxu1 %vm384_vm2, %v565_v13 }
 0x23f   :  { %1108 = vmatprep.mubr.msk.f32.mxu1 %vm384_vm2, %v566_v14 }
 0x242   :  { %1109 = vmatmul.mubr.msk.f32.gmra.mrb[12].mxu1 %vm384_vm2, %v567_v15 }
 0x243   :  { %1111 = vmatprep.mubr.msk.f32.mxu1 %vm384_vm2, %v568_v16 }
 0x246   :  { %1112 = vmatmul.mubr.msk.f32.gmra.mrb[14].mxu1 %vm384_vm2, %v569_v17 }
 0x247   :  { %1130 = vmatprep.mubr.msk.f32.mxu1 %vm1306_vm4, %v1307_v19 }
 0x30d   :  { %v1104_v23 = vpop.f32.mrb[8].mxu1 }
 0x30e   :  { %v714_v25 = vadd.f32 %v1104_v23, %v586_v20  ;;  %v708_v26 = vpop.f32.mrb[9].mxu1 }
 0x30f   :  { %v709_v27 = vadd.f32 %v708_v26, %v581_v21 }
 0x310   :  { %v757_v28 = vmul.f32 1.442695, %v714_v25  ;;  %vm748_vm5 = vcmp.gt.f32.partialorder %v714_v25, 0.0 }
 0x311   :  { %v755_v29 = vmul.f32 1.442695, %v709_v27  ;;  %v1107_v30 = vpop.f32.mrb[10].mxu1  ;;  %vm747_vm6 = vcmp.gt.f32.partialorder %v709_v27, 0.0 }
 0x312   :  { %1264 = vpow2.f32 %v757_v28  ;;  %v724_v31 = vadd.f32 %v1107_v30, %v596_v22  ;;  %v718_v32 = vpop.f32.mrb[11].mxu1 }
 0x313   :  { %1266 = vpow2.f32 %v755_v29  ;;  %v719_v34 = vadd.f32 %v718_v32, %v591_v24 }
 0x314   :  { %v761_v36 = vmul.f32 1.442695, %v724_v31  ;;  %vm750_vm7 = vcmp.gt.f32.partialorder %v724_v31, 0.0 }
 0x315   :  { %v759_v37 = vmul.f32 1.442695, %v719_v34  ;;  %v1110_v38 = vpop.f32.mrb[12].mxu1  ;;  %vm749_vm8 = vcmp.gt.f32.partialorder %v719_v34, 0.0 }
 0x316   :  { %1268 = vpow2.f32 %v761_v36  ;;  %v734_v39 = vadd.f32 %v1110_v38, %v606_v33  ;;  %v728_v40 = vpop.f32.mrb[13].mxu1 }
 0x317   :  { %1270 = vpow2.f32 %v759_v37  ;;  %v729_v41 = vadd.f32 %v728_v40, %v601_v35 }
 0x318   :  { %v765_v42 = vmul.f32 1.442695, %v734_v39  ;;  %vm752_vm9 = vcmp.gt.f32.partialorder %v734_v39, 0.0 }
 0x319   :  { %v763_v44 = vmul.f32 1.442695, %v729_v41  ;;  %v1113_v45 = vpop.f32.mrb[14].mxu1  ;;  %vm751_vm10 = vcmp.gt.f32.partialorder %v729_v41, 0.0 }
 0x31a   :  { %1272 = vpow2.f32 %v765_v42  ;;  %v744_v47 = vadd.f32 %v1113_v45, %v616_v43  ;;  %v738_v48 = vpop.f32.mrb[15].mxu1 }
 0x31b   :  { %1274 = vpow2.f32 %v763_v44  ;;  %v739_v49 = vadd.f32 %v738_v48, %v611_v46 }
 0x31c   :  { %v1265_v50 = vpop.eup %1264  ;;  %v769_v51 = vmul.f32 1.442695, %v744_v47  ;;  %vm754_vm11 = vcmp.gt.f32.partialorder %v744_v47, 0.0 }
 0x31d   :  { %v1267_v52 = vpop.eup %1266  ;;  %v941_v53 = vadd.f32 -1.0, %v1265_v50  ;;  %v767_v54 = vmul.f32 1.442695, %v739_v49  ;;  %vm753_vm12 = vcmp.gt.f32.partialorder %v739_v49, 0.0 }
 0x31e   :  { %v940_v55 = vadd.f32 -1.0, %v1267_v52  ;;  %1276 = vpow2.f32 %v769_v51 }
 0x31f   :  { %v780_v56 = vmul.f32 1.6732632, %v941_v53  ;;  %1278 = vpow2.f32 %v767_v54 }
 0x320   :  { %v1269_v57 = vpop.eup %1268  ;;  %v779_v58 = vmul.f32 1.6732632, %v940_v55 }
 0x321   :  { %v1271_v59 = vpop.eup %1270  ;;  %v788_v60 = vsel %vm748_vm5, %v714_v25, %v780_v56  ;;  %v943_v61 = vadd.f32 -1.0, %v1269_v57  ;;  %v795_v25 = vld [vmem:[%s1635_s7] sm:$0x1] }
 0x322   :  { %v787_v62 = vsel %vm747_vm6, %v709_v27, %v779_v58  ;;  %v942_v63 = vadd.f32 -1.0, %v1271_v59 }
 0x323   :  { %v1214_v0 = vpack.c.bf16 %v788_v60, %v787_v62  ;;  %v782_v1 = vmul.f32 1.6732632, %v943_v61 }
 0x324   :  { %v1273_v2 = vpop.eup %1272  ;;  %v781_v3 = vmul.f32 1.6732632, %v942_v63 }
 0x325   :  { %v1275_v4 = vpop.eup %1274  ;;  %v790_v5 = vsel %vm750_vm7, %v724_v31, %v782_v1  ;;  %v945_v6 = vadd.f32 -1.0, %v1273_v2  ;;  %1215 = vmatpush3.bf16.msra.mxu1 %v1214_v0 }
 0x326   :  { %v789_v7 = vsel %vm749_vm8, %v719_v34, %v781_v3  ;;  %v944_v8 = vadd.f32 -1.0, %v1275_v4  ;;  %1216 = vmatprep.subr.bf16.mxu1 %v1305_v18 }
 0x327   :  { %v1217_v9 = vpack.c.bf16 %v790_v5, %v789_v7  ;;  %v784_v10 = vmul.f32 1.6732632, %v945_v6 }
 0x328   :  { %v1277_v11 = vpop.eup %1276  ;;  %v783_v12 = vmul.f32 1.6732632, %v944_v8 }
 0x329   :  { %v1279_v13 = vpop.eup %1278  ;;  %v792_v14 = vsel %vm752_vm9, %v734_v39, %v784_v10  ;;  %v947_v15 = vadd.f32 -1.0, %v1277_v11  ;;  %1218 = vmatpush3.bf16.msra.mxu1 %v1217_v9 }
 0x32a   :  { %v791_v16 = vsel %vm751_vm10, %v729_v41, %v783_v12  ;;  %v946_v17 = vadd.f32 -1.0, %v1279_v13  ;;  %1219 = vmatprep.subr.bf16.mxu1 %v1305_v18 }
 0x32b   :  { %v1220_v19 = vpack.c.bf16 %v792_v14, %v791_v16  ;;  %v786_v20 = vmul.f32 1.6732632, %v947_v15 }
 0x32c   :  { %v785_v21 = vmul.f32 1.6732632, %v946_v17 }
 0x32d   :  { %v794_v22 = vsel %vm754_vm11, %v744_v47, %v786_v20  ;;  %1221 = vmatpush3.bf16.msra.mxu1 %v1220_v19 }
 0x32e   :  { %v793_v23 = vsel %vm753_vm12, %v739_v49, %v785_v21  ;;  %1222 = vmatprep.subr.bf16.mxu1 %v1305_v18 }
 0x32f   :  { %v1223_v24 = vpack.c.bf16 %v794_v22, %v793_v23 }
 0x331   :  { %1224 = vmatpush3.bf16.msra.mxu1 %v1223_v24 }
 0x334   :  { %1131 = vmatmul.mubr.msk.f32.vlgmr.msra.gmra.mrb[16].mxu1 %vm384_vm2, %v795_v25 }
 0x407   :  { %v865_v26 = vpop.f32.mrb[16].mxu1 }
 0x408   :  { %869 = vst [vmem:[#allocation2] sm:$0x1] %v865_v26  ;;  %v1132_v27 = vpop.f32.mrb[17].mxu1 }
 0x409   :  { %1291 = shalt.err (!%p1288_p4)
}
 0x40a   :  { %s1292_s7 = scalar_lea.hbm %s1636_s8, 16 }
 0x40b   :  { %p1293_p5 = scmp.ne.s32.totalorder %s1636_s8, %s1292_s7  ;;  %p1296_p6 = scmp.lt.u32.totalorder %s1292_s7, %s1636_s8 }
 0x40d   :  { %p1298_p7 = pnand %p1296_p6, %p1293_p5 }
 0x40f   :  { %1301 = shalt.err (!%p1298_p7)
}
 0x410   :  { %879 = dma.vmem_to_hbm [thread:$0]  %s877_s11, 16, %s1636_s8, [#allocation3]  }
 0x411   :  { %1302 = dma.done.wait [#allocation3], 16  }
 0x412   :  { %1303 = vsyncadd [#allocation3], 4294967280 }
 0x413   :  { %883 = vsyncpa [#allocation3], 1 }

</bundles_post_ra>
